<compile_context>
chip_gen: v7x
topology: tpu7x:2x2x1
jax: 0.10.0
libtpu: 0.0.40
codegen_flags: <defaults>
</compile_context>

<pallas_src>
from functools import partial

import jax
import jax.numpy as jnp
from jax.experimental import pallas as pl
from jax.experimental.pallas import tpu as pltpu

_LN_EPS = 1e-5          # nn.LayerNorm default
_BF16 = jnp.bfloat16


def _layernorm(x, w, b):
    # LayerNorm subclass in the reference always computes in float32.
    x = x.astype(jnp.float32)
    mu = jnp.mean(x, axis=-1, keepdims=True)
    var = jnp.mean(jnp.square(x - mu), axis=-1, keepdims=True)
    return (x - mu) * jax.lax.rsqrt(var + _LN_EPS) * w + b


def _invariant_spec(shape, index_map):
    """BlockSpec for a grid-invariant operand (same block every grid step):
    single-buffered, since double-buffering it only wastes VMEM."""
    try:
        return pl.BlockSpec(shape, index_map, pipeline_mode=pl.Buffered(1))
    except Exception:  # older jax without pipeline_mode / Buffered(1)
        return pl.BlockSpec(shape, index_map)


def _vmem_cap_bytes():
    """3/4 of physical VMEM: leaves headroom for compiler scratch and the
    pipeline's own buffers (important on v7x where VMEM is only 64 MiB)."""
    try:
        phys = int(pltpu.get_tpu_info().vmem_capacity_bytes)
    except Exception:
        phys = 128 << 20
    return (phys * 3) // 4


# ------------------------- Pallas kernels -------------------------

def _patch_embed_ln_kernel(p_ref, w_ref, pos_ref, lnw_ref, lnb_ref, o_ref):
    # Conv2d(kernel=stride=patch, bias=False) == patch-flatten + matmul,
    # fused with the positional-embedding add and ln_pre (this stage is
    # HBM-bandwidth bound: one read of the patches, one write of the tokens).
    emb = jnp.dot(p_ref[0].astype(_BF16), w_ref[...],
                  preferred_element_type=jnp.float32)            # (Np, D)
    o_ref[0] = _layernorm(emb + pos_ref[...], lnw_ref[0], lnb_ref[0])


def _head_kernel(x_ref, w_ref, b_ref, proj_ref, o_ref):
    # ln_post on the CLS token followed by the output projection.
    h = _layernorm(x_ref[...], w_ref[0], b_ref[0])
    o_ref[...] = jnp.dot(h.astype(_BF16), proj_ref[...],
                         preferred_element_type=jnp.float32)


def _block_kernel(x_ref, ln1w, ln1b, wqkv, bqkv, wo, bo,
                  ln2w, ln2b, wfc, bfc, wpj, bpj, o_ref, attn_sc,
                  *, n_head, mlp_chunk):
    """One ResidualAttentionBlock for a single batch element (grid over B)."""
    x = x_ref[0].astype(jnp.float32)               # (S, D) residual stream, f32
    S, D = x.shape
    hd = D // n_head

    # ---- multi-head self-attention (attn_mask / key_padding_mask are None) ----
    # The 1/sqrt(hd) scale is folded into the q columns of wqkv/bqkv at init.
    h = _layernorm(x, ln1w[0], ln1b[0])
    qkv = jnp.dot(h.astype(_BF16), wqkv[...],
                  preferred_element_type=jnp.float32) + bqkv[0]
    qkv_b = qkv.astype(_BF16)

    for hh in range(n_head):                        # static unroll over heads
        q_h = qkv_b[:, hh * hd:(hh + 1) * hd]
        k_h = qkv_b[:, D + hh * hd:D + (hh + 1) * hd]
        v_h = qkv_b[:, 2 * D + hh * hd:2 * D + (hh + 1) * hd]
        # 'qd,kd->qk': contract the head dim directly; no materialized k.T.
        s = jax.lax.dot_general(q_h, k_h, (((1,), (1,)), ((), ())),
                                preferred_element_type=jnp.float32)   # (S, S)
        s = s - jnp.max(s, axis=-1, keepdims=True)
        e = jnp.exp(s)   # TODO(synk): bf16 exp on v6e/v7x (keep f32 on v5e)
        inv = pl.reciprocal(jnp.sum(e, axis=-1, keepdims=True), approx=True)
        p = (e * inv).astype(_BF16)
        # write each head's output straight into the bf16 VMEM slab
        attn_sc[:, hh * hd:(hh + 1) * hd] = jnp.dot(
            p, v_h, preferred_element_type=jnp.float32).astype(_BF16)

    # single K=D output projection on the concatenated head outputs
    x = x + jnp.dot(attn_sc[...], wo[...],
                    preferred_element_type=jnp.float32) + bo[0]

    # ---- MLP: c_fc -> QuickGELU -> c_proj, chunked over the 4*D hidden ----
    h2 = _layernorm(x, ln2w[0], ln2b[0]).astype(_BF16)
    acc = x + bpj[0]
    hidden = wfc.shape[1]
    for c0 in range(0, hidden, mlp_chunk):           # static unroll over chunks
        c1 = min(c0 + mlp_chunk, hidden)
        m = jnp.dot(h2, wfc[:, c0:c1],
                    preferred_element_type=jnp.float32) + bfc[0, c0:c1]
        m = m * jax.nn.sigmoid(1.702 * m)            # QuickGELU, f32
        acc = acc + jnp.dot(m.astype(_BF16), wpj[c0:c1, :],
                            preferred_element_type=jnp.float32)
    o_ref[0] = acc


# ------------------------- wrappers -------------------------

def patch_embed_ln_pre(patches, conv_w, pos_patch, lnw, lnb):
    """Fused patch-embed + pos_emb + ln_pre for the patch tokens."""
    B, n_p, cpp = patches.shape
    d = conv_w.shape[1]
    return pl.pallas_call(
        _patch_embed_ln_kernel,
        out_shape=jax.ShapeDtypeStruct((B, n_p, d), jnp.float32),
        grid=(B,),
        in_specs=[pl.BlockSpec((1, n_p, cpp), lambda b: (b, 0, 0)),
                  _invariant_spec((cpp, d), lambda b: (0, 0)),
                  _invariant_spec((n_p, d), lambda b: (0, 0)),
                  _invariant_spec((1, d), lambda b: (0, 0)),
                  _invariant_spec((1, d), lambda b: (0, 0))],
        out_specs=pl.BlockSpec((1, n_p, d), lambda b: (b, 0, 0)),
        compiler_params=pltpu.CompilerParams(
            dimension_semantics=("parallel",)),
    )(patches, conv_w, pos_patch, lnw, lnb)


def residual_block(x, layer_params, n_head):
    B, S, D = x.shape
    weights = list(layer_params)
    hidden = 4 * D
    # Chunk the MLP hidden dim so the (S, chunk) f32 intermediate stays small.
    mlp_chunk = hidden if hidden <= 2048 else 2048

    # VMEM budget: single-buffered weights + double-buffered (S, D) f32 in/out
    # blocks + in-kernel f32 working set (x, h, qkv, a couple of (S, S) score
    # tiles, MLP chunk, accumulator) + bf16 attention slab + margin.
    wbytes = sum(int(w.size) * w.dtype.itemsize for w in weights)
    act_bytes = 4 * S * (7 * D + 2 * S + mlp_chunk) + 2 * S * D
    est = wbytes + 4 * S * D * 4 + act_bytes + (4 << 20)
    vmem_limit = int(min(max(est, 32 << 20), _vmem_cap_bytes()))

    # TODO(synk): for tiny/odd B on v7x (2 TCs/chip) add a second "parallel"
    # query-tile grid axis (flash-style) so both TensorCores are occupied.
    in_specs = [pl.BlockSpec((1, S, D), lambda b: (b, 0, 0))]
    # Grid-invariant weights: same block every step, DMA'd once, single-buffered.
    in_specs += [_invariant_spec(w.shape, lambda b: (0, 0)) for w in weights]
    return pl.pallas_call(
        partial(_block_kernel, n_head=n_head, mlp_chunk=mlp_chunk),
        out_shape=jax.ShapeDtypeStruct((B, S, D), jnp.float32),
        grid=(B,),
        in_specs=in_specs,
        out_specs=pl.BlockSpec((1, S, D), lambda b: (b, 0, 0)),
        scratch_shapes=[pltpu.VMEM((S, D), _BF16)],   # per-head output slab
        compiler_params=pltpu.CompilerParams(
            dimension_semantics=("parallel",),
            vmem_limit_bytes=vmem_limit),
    )(x, *weights)


def init_params(key, *, width, layers, heads, patch, res, out_dim):
    """Parameters stored in their kernel-ready layout:
    matmul weights pre-transposed and in bf16, LN params / biases in f32,
    and the 1/sqrt(head_dim) attention scale folded into the q columns of
    wqkv (the q slice of bqkv would need the same scaling; it is zeros here)."""
    d = width
    scale = d ** -0.5
    proj_std = (d ** -0.5) * ((2 * layers) ** -0.5)
    attn_std = d ** -0.5
    fc_std = (2 * d) ** -0.5
    q_scale = (d // heads) ** -0.5
    n_tokens = (res // patch) ** 2 + 1
    ki = iter(jax.random.split(key, 8 + 6 * layers))
    nrm = lambda k, shp, std: std * jax.random.normal(k, shp, jnp.float32)
    P = {
        # (C*p*p, d), pre-transposed flat conv weight, bf16
        "conv_w_flat": nrm(next(ki), (3 * patch * patch, d), 0.02).astype(_BF16),
        "class_emb": nrm(next(ki), (1, d), scale),
        "pos_emb": nrm(next(ki), (n_tokens, d), scale),
        "ln_pre_w": jnp.ones((1, d), jnp.float32),
        "ln_pre_b": jnp.zeros((1, d), jnp.float32),
        "ln_post_w": jnp.ones((1, d), jnp.float32),
        "ln_post_b": jnp.zeros((1, d), jnp.float32),
        "proj": nrm(next(ki), (d, out_dim), scale).astype(_BF16),
        "blocks": [],
    }
    for _ in range(layers):
        wqkv = nrm(next(ki), (d, 3 * d), attn_std)        # in_proj_weight.T
        wqkv = wqkv.at[:, :d].multiply(q_scale)           # fold attention scale into q
        P["blocks"].append({
            "ln1w": jnp.ones((1, d), jnp.float32),
            "ln1b": jnp.zeros((1, d), jnp.float32),
            "wqkv": wqkv.astype(_BF16),
            "bqkv": jnp.zeros((1, 3 * d), jnp.float32),   # in_proj_bias (zeros)
            "wo": nrm(next(ki), (d, d), proj_std).astype(_BF16),   # out_proj.weight.T
            "bo": jnp.zeros((1, d), jnp.float32),
            "ln2w": jnp.ones((1, d), jnp.float32),
            "ln2b": jnp.zeros((1, d), jnp.float32),
            "wfc": nrm(next(ki), (d, 4 * d), fc_std).astype(_BF16),      # c_fc.weight.T
            "bfc": nrm(next(ki), (1, 4 * d), 0.01),
            "wpj": nrm(next(ki), (4 * d, d), proj_std).astype(_BF16),    # c_proj.weight.T
            "bpj": nrm(next(ki), (1, d), 0.01),
        })
    return P


def vit_forward(x_img, P, *, patch, heads, layers):
    B, C, H, W = x_img.shape
    d = P["conv_w_flat"].shape[1]
    cpp = C * patch * patch
    hp, wp = H // patch, W // patch
    n_p = hp * wp

    # patch extraction (glue): NCHW -> (B, Np, C*p*p), flatten order (C, kh, kw)
    patches = x_img.reshape(B, C, hp, patch, wp, patch)
    patches = patches.transpose(0, 2, 4, 1, 3, 5).reshape(B, n_p, cpp)

    # fused patch-embed + pos_emb + ln_pre for the patch tokens (one HBM pass)
    tok = patch_embed_ln_pre(patches, P["conv_w_flat"], P["pos_emb"][1:],
                             P["ln_pre_w"], P["ln_pre_b"])
    # CLS token row: batch-independent (1, d) computation, done in plain JAX.
    cls_row = _layernorm(P["class_emb"] + P["pos_emb"][0:1],
                         P["ln_pre_w"][0], P["ln_pre_b"][0])
    x = jnp.concatenate([jnp.broadcast_to(cls_row, (B, 1, d)), tok], axis=1)

    # TODO(synk): optionally carry the inter-layer residual stream as bf16 to
    # halve the per-layer HBM round trip; kept f32 here for exact parity.
    half_feature = []
    for i in range(layers):
        if i == layers // 2:
            x = jax.lax.stop_gradient(x)       # x.detach() in the reference
        blk = P["blocks"][i]
        layer_params = (blk["ln1w"], blk["ln1b"],
                        blk["wqkv"], blk["bqkv"],
                        blk["wo"], blk["bo"],
                        blk["ln2w"], blk["ln2b"],
                        blk["wfc"], blk["bfc"],
                        blk["wpj"], blk["bpj"])
        x = residual_block(x, layer_params, heads)
        if i % 2 == 1 and i >= layers // 2:
            # PyTorch appends x.detach().permute(1, 0, 2) == (B, S, D); ours already is.
            half_feature.append(jax.lax.stop_gradient(x))

    cls_tok = x[:, 0, :]
    out = pl.pallas_call(
        _head_kernel,
        out_shape=jax.ShapeDtypeStruct((B, P["proj"].shape[1]), jnp.float32),
    )(cls_tok, P["ln_post_w"], P["ln_post_b"], P["proj"])
    return out, half_feature


# ------------------------- pure-JAX reference -------------------------

def reference_forward(x_img, P, *, patch, heads, layers):
    f32 = lambda a: a.astype(jnp.float32)
    B, C, H, W = x_img.shape
    d = P["conv_w_flat"].shape[1]
    hp, wp = H // patch, W // patch
    n_p = hp * wp
    patches = x_img.reshape(B, C, hp, patch, wp, patch)
    patches = patches.transpose(0, 2, 4, 1, 3, 5).reshape(B, n_p, -1)
    x = patches @ f32(P["conv_w_flat"])
    cls = jnp.broadcast_to(P["class_emb"], (B, 1, d))
    x = jnp.concatenate([cls, x], axis=1) + P["pos_emb"]
    x = _layernorm(x, P["ln_pre_w"][0], P["ln_pre_b"][0])
    S = x.shape[1]
    hd = d // heads
    for i in range(layers):
        blk = P["blocks"][i]
        h = _layernorm(x, blk["ln1w"][0], blk["ln1b"][0])
        qkv = h @ f32(blk["wqkv"]) + blk["bqkv"][0]
        q, k, v = jnp.split(qkv, 3, axis=-1)
        q = q.reshape(B, S, heads, hd)
        k = k.reshape(B, S, heads, hd)
        v = v.reshape(B, S, heads, hd)
        # NOTE: 1/sqrt(hd) is already folded into the q columns of wqkv.
        s = jnp.einsum("bqhd,bkhd->bhqk", q, k)
        p = jax.nn.softmax(s, axis=-1)
        a = jnp.einsum("bhqk,bkhd->bqhd", p, v).reshape(B, S, d)
        x = x + a @ f32(blk["wo"]) + blk["bo"][0]
        h2 = _layernorm(x, blk["ln2w"][0], blk["ln2b"][0])
        m = h2 @ f32(blk["wfc"]) + blk["bfc"][0]
        m = m * jax.nn.sigmoid(1.702 * m)
        x = x + m @ f32(blk["wpj"]) + blk["bpj"][0]
    return _layernorm(x[:, 0, :], P["ln_post_w"][0], P["ln_post_b"][0]) @ f32(P["proj"])


if __name__ == "__main__":
    B, C, res, patch = 2, 3, 16, 4
    width, layers, heads, out_dim = 32, 2, 4, 16

    key = jax.random.PRNGKey(0)
    kp, kx = jax.random.split(key)
    P = init_params(kp, width=width, layers=layers, heads=heads,
                    patch=patch, res=res, out_dim=out_dim)
    x_img = jax.random.normal(kx, (B, C, res, res), jnp.float32)

    out, half_feat = vit_forward(x_img, P, patch=patch, heads=heads, layers=layers)
    out = jax.block_until_ready(out)
    for hf in half_feat:
        jax.block_until_ready(hf)

    assert out.shape == (B, out_dim)
    assert len(half_feat) == 1
    assert half_feat[0].shape == (B, (res // patch) ** 2 + 1, width)

    ref = reference_forward(x_img, P, patch=patch, heads=heads, layers=layers)
    # bf16 MXU operands with f32 accumulation -> a slightly looser tolerance
    # than pure f32, but both sides use identical (bf16-stored) weights.
    if not jnp.allclose(out, ref, rtol=2e-2, atol=2e-2):
        raise AssertionError("Pallas output mismatch vs pure-JAX reference")

    print("KERNEL_OK")
</pallas_src>

<mosaic_0001>
module attributes {stable_mosaic.version = 11 : i64} {
  func.func @_patch_embed_ln_kernel(%arg0: i32, %arg1: memref<1x16x48xf32, #tpu.memory_space<vmem>>, %arg2: memref<48x32xbf16, #tpu.memory_space<vmem>>, %arg3: memref<16x32xf32, #tpu.memory_space<vmem>>, %arg4: memref<1x32xf32, #tpu.memory_space<vmem>>, %arg5: memref<1x32xf32, #tpu.memory_space<vmem>>, %arg6: memref<1x16x32xf32, #tpu.memory_space<vmem>>) attributes {dimension_semantics = [#tpu.dimension_semantics<parallel>], iteration_bounds = array<i64: 2>, scalar_prefetch = 0 : i64, scratch_operands = 0 : i64, tpu.core_type = #tpu.core_type<tc>, window_params = [{transform_indices = @transform_0, window_bounds = array<i64: 1, 16, 48>}, {pipeline_mode = #tpu.pipeline_mode<synchronous>, transform_indices = @transform_1, window_bounds = array<i64: 48, 32>}, {pipeline_mode = #tpu.pipeline_mode<synchronous>, transform_indices = @transform_2, window_bounds = array<i64: 16, 32>}, {pipeline_mode = #tpu.pipeline_mode<synchronous>, transform_indices = @transform_3, window_bounds = array<i64: 1, 32>}, {pipeline_mode = #tpu.pipeline_mode<synchronous>, transform_indices = @transform_4, window_bounds = array<i64: 1, 32>}, {transform_indices = @transform_5, window_bounds = array<i64: 1, 16, 32>}]} {
    %c0 = arith.constant 0 : index
    %c0_0 = arith.constant 0 : index
    %c0_1 = arith.constant 0 : index
    %0 = vector.load %arg1[%c0, %c0_0, %c0_1] : memref<1x16x48xf32, #tpu.memory_space<vmem>>, vector<1x16x48xf32>
    %1 = vector.shape_cast %0 : vector<1x16x48xf32> to vector<16x48xf32>
    %2 = arith.truncf %1 : vector<16x48xf32> to vector<16x48xbf16>
    %c0_2 = arith.constant 0 : index
    %c0_3 = arith.constant 0 : index
    %3 = vector.load %arg2[%c0_2, %c0_3] : memref<48x32xbf16, #tpu.memory_space<vmem>>, vector<48x32xbf16>
    %cst = arith.constant dense<0.000000e+00> : vector<16x32xf32>
    %4 = tpu.matmul %2, %3, %cst {dimension_numbers = #tpu.dot_dimension_numbers<[1], [0], [0], [1], [0, 0, 1, 1], [], []>} : vector<16x48xbf16>, vector<48x32xbf16>, vector<16x32xf32> -> vector<16x32xf32>
    %c0_4 = arith.constant 0 : index
    %c0_5 = arith.constant 0 : index
    %5 = vector.load %arg3[%c0_4, %c0_5] : memref<16x32xf32, #tpu.memory_space<vmem>>, vector<16x32xf32>
    %6 = arith.addf %4, %5 : vector<16x32xf32>
    %c0_6 = arith.constant 0 : index
    %c0_7 = arith.constant 0 : index
    %7 = vector.load %arg4[%c0_6, %c0_7] : memref<1x32xf32, #tpu.memory_space<vmem>>, vector<1x32xf32>
    %8 = vector.shape_cast %7 : vector<1x32xf32> to vector<32xf32>
    %c0_8 = arith.constant 0 : index
    %c0_9 = arith.constant 0 : index
    %9 = vector.load %arg5[%c0_8, %c0_9] : memref<1x32xf32, #tpu.memory_space<vmem>>, vector<1x32xf32>
    %10 = vector.shape_cast %9 : vector<1x32xf32> to vector<32xf32>
    %cst_10 = arith.constant dense<0.000000e+00> : vector<16xf32>
    %11 = vector.multi_reduction <add>, %6, %cst_10 [1] : vector<16x32xf32> to vector<16xf32>
    %12 = vector.shape_cast %11 : vector<16xf32> to vector<16x1xf32>
    %cst_11 = arith.constant 3.200000e+01 : f32
    %13 = vector.broadcast %cst_11 : f32 to vector<16x1xf32>
    %14 = arith.divf %12, %13 : vector<16x1xf32>
    %15 = vector.broadcast %14 : vector<16x1xf32> to vector<16x32xf32>
    %16 = arith.subf %6, %15 : vector<16x32xf32>
    %17 = arith.mulf %16, %16 : vector<16x32xf32>
    %cst_12 = arith.constant dense<0.000000e+00> : vector<16xf32>
    %18 = vector.multi_reduction <add>, %17, %cst_12 [1] : vector<16x32xf32> to vector<16xf32>
    %19 = vector.shape_cast %18 : vector<16xf32> to vector<16x1xf32>
    %cst_13 = arith.constant 3.200000e+01 : f32
    %20 = vector.broadcast %cst_13 : f32 to vector<16x1xf32>
    %21 = arith.divf %19, %20 : vector<16x1xf32>
    %22 = vector.broadcast %14 : vector<16x1xf32> to vector<16x32xf32>
    %23 = arith.subf %6, %22 : vector<16x32xf32>
    %cst_14 = arith.constant 9.99999974E-6 : f32
    %24 = vector.broadcast %cst_14 : f32 to vector<16x1xf32>
    %25 = arith.addf %21, %24 : vector<16x1xf32>
    %26 = math.rsqrt %25 : vector<16x1xf32>
    %27 = vector.broadcast %26 : vector<16x1xf32> to vector<16x32xf32>
    %28 = arith.mulf %23, %27 : vector<16x32xf32>
    %29 = vector.shape_cast %8 : vector<32xf32> to vector<1x32xf32>
    %30 = vector.broadcast %29 : vector<1x32xf32> to vector<16x32xf32>
    %31 = arith.mulf %28, %30 : vector<16x32xf32>
    %32 = vector.shape_cast %10 : vector<32xf32> to vector<1x32xf32>
    %33 = vector.broadcast %32 : vector<1x32xf32> to vector<16x32xf32>
    %34 = arith.addf %31, %33 : vector<16x32xf32>
    %c0_15 = arith.constant 0 : index
    %c0_16 = arith.constant 0 : index
    %c0_17 = arith.constant 0 : index
    %35 = vector.load %arg6[%c0_15, %c0_16, %c0_17] : memref<1x16x32xf32, #tpu.memory_space<vmem>>, vector<1x16x32xf32>
    %36 = vector.shape_cast %35 : vector<1x16x32xf32> to vector<16x32xf32>
    %37 = vector.shape_cast %34 : vector<16x32xf32> to vector<1x16x32xf32>
    tpu.vector_store %arg6[%c0_15, %c0_16, %c0_17], %37 {strides = array<i32>} : memref<1x16x32xf32, #tpu.memory_space<vmem>>, vector<1x16x32xf32>,
    return
  }
  func.func @transform_0(%arg0: i32) -> (i32, i32, i32) {
    %c0_i32 = arith.constant 0 : i32
    %c0_i32_0 = arith.constant 0 : i32
    %c0_i32_1 = arith.constant 0 : i32
    return %arg0, %c0_i32, %c0_i32_0 : i32, i32, i32
  }
  func.func @transform_1(%arg0: i32) -> (i32, i32) {
    %c0_i32 = arith.constant 0 : i32
    %c0_i32_0 = arith.constant 0 : i32
    %c0_i32_1 = arith.constant 0 : i32
    return %c0_i32, %c0_i32_0 : i32, i32
  }
  func.func @transform_2(%arg0: i32) -> (i32, i32) {
    %c0_i32 = arith.constant 0 : i32
    %c0_i32_0 = arith.constant 0 : i32
    %c0_i32_1 = arith.constant 0 : i32
    return %c0_i32, %c0_i32_0 : i32, i32
  }
  func.func @transform_3(%arg0: i32) -> (i32, i32) {
    %c0_i32 = arith.constant 0 : i32
    %c0_i32_0 = arith.constant 0 : i32
    %c0_i32_1 = arith.constant 0 : i32
    return %c0_i32, %c0_i32_0 : i32, i32
  }
  func.func @transform_4(%arg0: i32) -> (i32, i32) {
    %c0_i32 = arith.constant 0 : i32
    %c0_i32_0 = arith.constant 0 : i32
    %c0_i32_1 = arith.constant 0 : i32
    return %c0_i32, %c0_i32_0 : i32, i32
  }
  func.func @transform_5(%arg0: i32) -> (i32, i32, i32) {
    %c0_i32 = arith.constant 0 : i32
    %c0_i32_0 = arith.constant 0 : i32
    %c0_i32_1 = arith.constant 0 : i32
    return %arg0, %c0_i32, %c0_i32_0 : i32, i32, i32
  }
}

</mosaic_0001>

<bundles_post_ra>
// kernel: tpu_custom_call.1
= control target key start
LH: loop header
LB: loop body
LE: loop exit
PB: predicated region body
PF: predicated region fallthrough
CT: control target
= control target key end

     0   :  { %10 = vsyncpa [#allocation3], 0  ;;  %s841_s0 = inlined_call_operand.vmem [shape: f32[2,16,48], index: 0, kind: input, shape index: {}]   ;;  %s842_s1 = inlined_call_operand.vmem [shape: bf16[48,32], index: 1, kind: input, shape index: {}]   ;;  %s843_s2 = inlined_call_operand.hbm [shape: f32[16,32], index: 2, kind: input, shape index: {}]   ;;  %s844_s3 = inlined_call_operand.vmem [shape: f32[1,32], index: 3, kind: input, shape index: {}]   ;;  %s845_s4 = inlined_call_operand.vmem [shape: f32[1,32], index: 4, kind: input, shape index: {}]   ;;  %s846_s5 = inlined_call_operand.hbm [shape: f32[2,16,32], index: 5, kind: output, shape index: {}]  }
   0x1   :  { %11 = vsyncpa [#allocation4], 0 }
   0x2   :  { %13 = vsyncpa [#allocation4 + $0x1], 0  ;;  %s682_s18 = smov 0   ;;  %s684_s19 = smov 0  }
   0x3   :  { %s686_s20 = smov 0   ;;  %s688_s21 = smov 0  }
   0x4 LB: > { %s703_s22 = sadd.s32 4294967295, %s642_s21   ;;  %s449_s23 = sadd.s32 4294967294, %s642_s21   ;;  %s642_s21 = sphi %s688_s21, %s862_s21   ;;  %s638_s20 = sphi %s686_s20, %s861_s20   ;;  %s634_s19 = sphi %s684_s19, %s860_s19   ;;  %s630_s18 = sphi %s682_s18, %s859_s18  }
   0x5   : > { %s707_s24 = sadd.s32 1, %s642_s21   ;;  %s136_s25 = sadd.s32 1, %s638_s20 }
   0x6   : > { %s133_s26 = ssub.s32 %s642_s21, %s707_s24  ;;  %p146_p0 = scmp.ne.s32.totalorder %s638_s20, %s634_s19 }
   0x7   : > { %p134_p1 = scmp.eq.s32.totalorder %s133_s26, 0  ;;  %p147_p2 = scmp.eq.s32.totalorder %s703_s22, 1 }
   0x8   : > { %p152_p3 = scmp.ne.s32.totalorder %s634_s19, %s630_s18  ;;  %p153_p4 = scmp.eq.s32.totalorder %s449_s23, 1 }
   0x9   : > { %s718_s27 = scalar_select %p134_p1, %s638_s20, %s136_s25  }
   0xa   : > { %p720_p5 = por %p147_p2, %p146_p0  ;;  %p724_p6 = por %p153_p4, %p152_p3 }
   0xb   : > { %p450_p7 = scmp.ge.s32.totalorder %s642_s21, 1  ;;  %p160_p8 = scmp.lt.s32.totalorder %s642_s21, 3 }
   0xc   : > { %s850_s28 = scalar_select %p720_p5, 1, 0 }
   0xd   : > { %s851_s29 = scalar_select %p724_p6, 1, 0 }
   0xe   : > { %p847_p9 = scmp.eq.s32.totalorder %s703_s22, 0  ;;  %p731_p10 = pnand %p450_p7, %p160_p8 }
   0xf   : > { %s644_s6 = smov [#allocation2]   ;;  %s548_s11 = scalar_lea.hbm %s843_s2, 256 }
  0x10   : > { %s852_s30 = scalar_select %p731_p10, 1, 0 }
  0x11   : > { %s175_s7 = sshll.u32 %s644_s6, 4  ;;  %p491_p11 = pneg %p731_p10  ;;  %s176_s7 = int_to_ptr.vmem [resolvable:$true] %s175_s7 }
  0x12   : > { %p549_p13 = scmp.ne.s32.totalorder %s843_s2, %s548_s11  ;;  %p555_p3 = scmp.lt.u32.totalorder %s548_s11, %s843_s2 }
  0x13   : > { %p739_p12 = pnand %p847_p9, %p491_p11 }
  0x15   : > { %p550_p0 = pneg %p739_p12 }
  0x17   : > { %p551_p1 = pnand %p550_p0, %p549_p13 }
  0x19   : > { %p552_p2 = pneg %p551_p1 }
  0x1b   : > { %p557_p4 = pnand %p555_p3, %p552_p2 }
  0x1d   : > { %560 = shalt.err (!%p557_p4)
}
  0x1e   : > { %s561_s16 = scalar_lea.vmem %s176_s7, 256  ;;  %p569_p9 = scmp.lt.s32.totalorder %s176_s7, %s176_s7 }
  0x1f   : > { %p562_p7 = scmp.ne.s32.totalorder %s176_s7, %s561_s16  ;;  %p570_p6 = scmp.lt.s32.totalorder %s561_s16, %s561_s16 }
  0x21   : > { %p564_p8 = pnand %p562_p7, %p550_p0  ;;  %p571_p5 = por %p570_p6, %p569_p9 }
  0x23   : > { %p565_p11 = pneg %p564_p8 }
  0x25   : > { %p572_p10 = pnand %p571_p5, %p565_p11 }
  0x27   : > { %575 = shalt.err (!%p572_p10)
}
  0x28   : > { %s645_s17 = smov 128   ;;  %s646_s23 = smov 8  }
  0x29   : > { %494 = dma.hbm_to_vmem [thread:$0]  (!%p739_p12), %s843_s2, 256, %s176_s7, [#allocation3], %s645_s17, %s645_s17, %s646_s23  }
  0x2a   : > { %p854_p13 = scmp.ne.s32.totalorder %s852_s30, 0 }
  0x2b   : > { %p855_p1 = scmp.eq.s32.totalorder (!%p854_p13), %s703_s22, 0 }
  0x2c   : > { %205 = sbr.rel (%p854_p13) target bundleno = 611 (0x263), region = 40 }
  0x33   : > { %621 = dma.done.wait (%p855_p1), [#allocation3], 256   ;;  %p856_p0 = pmov %p855_p1 }
  0x34   : > { %p233_p5 = scmp.lt.s32.totalorder %s703_s22, 1  ;;  %v647_v0 = vmov 0.0   ;;  %vm648_vm0 = vmmov 0   ;;  %v541_v1 = vld [vmem:[%s842_s1] sm:$0xff]   ;;  %v542_v2 = vld [vmem:[%s842_s1 + $0x8] sm:$0xff]   ;;  %v543_v3 = vld [vmem:[%s842_s1 + $0x10] sm:$0xff]  }
  0x35   : > { %623 = vsyncadd (%p856_p0), [#allocation3], 4294967040  ;;  %475 = vmatprep.subr.bf16.mxu0 %v647_v0  ;;  %481 = vmatprep.mubr.msk.bf16.mxu0 %vm648_vm0, %v647_v0  ;;  %vm268_vm1 = vcmask 392192   ;;  %v248_v7 = vld [vmem:[#allocation2] sm:$0xff]  ;;  %v249_v9 = vld [vmem:[#allocation2 + $0x8] sm:$0xff]  ;;  %vm315_vm2 = vcmask 261120  }
  0x36   : > { %s234_s6 = scalar_select %p233_p5, %s703_s22, 1  ;;  %476 = vmatpush3.bf16.msra.mxu0 %v541_v1  ;;  %v462_v34 = vld [vmem:[%s844_s3] ss:$0 sm:$0xff] }
  0x37   : > { %477 = vmatprep.subr.bf16.mxu0 %v647_v0  ;;  %s230_s16 = sand.u32 1, %s634_s19   ;;  %v463_v36 = vld [vmem:[%s845_s4] ss:$0 sm:$0xff]  ;;  %s470_s8 = sshll.u32 %s703_s22, 8 }
  0x38   : > { %s469_s30 = sshll.u32 %s234_s6, 4  ;;  %s455_s25 = sshll.u32 %s230_s16, 4 }
  0x39   : > { %s237_s13 = scalar_lea.vmem %s841_s0, %s469_s30  ;;  %s232_s9 = scalar_lea.vmem [#allocation5], %s455_s25 }
  0x3a   : > { %478 = vmatpush3.bf16.msra.mxu0 %v542_v2  ;;  %v239_v4 = vld [vmem:[%s237_s13] sm:$0xff]  ;;  %v240_v5 = vld [vmem:[%s237_s13 + $0x8] sm:$0xff]  ;;  %s375_s30 = sshll.u32 %s232_s9, 4  ;;  %s795_s11 = scalar_lea.hbm %s846_s5, %s470_s8  ;;  %s797_s30 = int_to_ptr.vmem [resolvable:$true] %s375_s30 }
  0x3b   : > { %479 = vmatprep.subr.bf16.mxu0 %v647_v0  ;;  %v241_v6 = vpack.c.bf16 %v240_v5, %v239_v4  ;;  %s800_s12 = scalar_lea.sflag [#allocation4], %s230_s16  ;;  %s576_s22 = scalar_lea.vmem %s797_s30, 256 }
  0x3c   : > { %p577_p6 = scmp.ne.s32.totalorder %s797_s30, %s576_s22  ;;  %p857_p9 = scmp.ne.s32.totalorder %s850_s28, 0 }
  0x3d   : > { %s649_s13 = smov [#allocation5]  }
  0x3e   : > { %480 = vmatpush3.bf16.msra.mxu0 %v543_v3  ;;  %p578_p10 = pnand %p577_p6, %p857_p9  ;;  %s580_s14 = sshll.u32 %s649_s13, 4  ;;  %s581_s14 = int_to_ptr.vmem [resolvable:$false] %s580_s14 }
  0x3f   : > { %s582_s15 = scalar_lea.vmem %s581_s14, 512  ;;  %p583_p2 = scmp.lt.s32.totalorder %s797_s30, %s581_s14 }
  0x40   : > { %p579_p12 = pneg %p578_p10  ;;  %p584_p3 = scmp.lt.s32.totalorder %s582_s15, %s576_s22 }
  0x41   : > { %482 = vmatmul.mubr.msk.bf16.vlgmr.msra.gmra.mrb[0].mxu0 %vm268_vm1, %v241_v6 }
  0x42   : > { %p585_p4 = por %p584_p3, %p583_p2 }
  0x44   : > { %p586_p7 = pnand %p585_p4, %p579_p12 }
 0x114   : > { %v306_v8 = vpop.f32.mrb[0].mxu0 }
 0x115   : > { %v307_v10 = vadd.f32 %v306_v8, %v248_v7  ;;  %v483_v11 = vpop.f32.mrb[1].mxu0 }
 0x116   : > { %v309_v12 = vpop.f32.mrb[2].mxu0 }
 0x117   : > { %v310_v13 = vadd.f32 %v309_v12, %v249_v9  ;;  %v484_v14 = vpop.f32.mrb[3].mxu0  ;;  %v316_v15 = vsel %vm315_vm2, %v307_v10, 0.0 }
 0x118   : > { %317 = vadd.xlane.f32.xlu0 %v316_v15 }
 0x119   : > { %v319_v16 = vsel %vm315_vm2, %v310_v13, 0.0 }
 0x11c   : > { %320 = vadd.xlane.f32.xlu0 %v319_v16 }
 0x1a5   : > { %v318_v17 = vpop.xlane.xlu0 %317 }
 0x1a6   : > { %v323_v18 = vmul.f32 0.03125, %v318_v17 }
 0x1a8   : > { %v325_v19 = vsub.f32 %v307_v10, %v323_v18 }
 0x1a9   : > { %v321_v20 = vpop.xlane.xlu0 %320 }
 0x1aa   : > { %v324_v21 = vmul.f32 0.03125, %v321_v20  ;;  %v327_v22 = vmul.f32 %v325_v19, %v325_v19 }
 0x1ac   : > { %v326_v23 = vsub.f32 %v310_v13, %v324_v21  ;;  %v329_v24 = vsel %vm315_vm2, %v327_v22, 0.0 }
 0x1ad   : > { %330 = vadd.xlane.f32.xlu1 %v329_v24 }
 0x1ae   : > { %v328_v25 = vmul.f32 %v326_v23, %v326_v23 }
 0x1b0   : > { %v332_v26 = vsel %vm315_vm2, %v328_v25, 0.0 }
 0x1b1   : > { %333 = vadd.xlane.f32.xlu1 %v332_v26 }
 0x23a   : > { %v331_v27 = vpop.xlane.xlu1 %330 }
 0x23b   : > { %v335_v28 = vmul.f32 0.03125, %v331_v27 }
 0x23d   : > { %v337_v29 = vadd.f32 1e-05, %v335_v28 }
 0x23e   : > { %v334_v30 = vpop.xlane.xlu1 %333 }
 0x23f   : > { %544 = vrsqrt.f32 %v337_v29  ;;  %v336_v31 = vmul.f32 0.03125, %v334_v30 }
 0x241   : > { %v338_v32 = vadd.f32 1e-05, %v336_v31 }
 0x243   : > { %546 = vrsqrt.f32 %v338_v32 }
 0x249   : > { %v545_v33 = vpop.eup %544 }
 0x24a   : > { %v341_v35 = vmul.f32 %v545_v33, %v325_v19 }
 0x24c   : > { %v349_v37 = vmul.f32 %v462_v34, %v341_v35 }
 0x24d   : > { %v547_v38 = vpop.eup %546 }
 0x24e   : > { %v357_v39 = vadd.f32 %v463_v36, %v349_v37  ;;  %v342_v40 = vmul.f32 %v547_v38, %v326_v23 }
 0x250   : > { %v350_v41 = vmul.f32 %v462_v34, %v342_v40  ;;  %359 = vst.msk [vmem:[%s232_s9] sm:$0xff] %vm315_vm2, %v357_v39 }
 0x252   : > { %v358_v42 = vadd.f32 %v463_v36, %v350_v41 }
 0x254   : > { %360 = vst.msk [vmem:[%s232_s9 + $0x8] sm:$0xff] %vm315_vm2, %v358_v42 }
 0x255   : > { %589 = shalt.err (!%p586_p7)
}
 0x256   : > { %s590_s16 = scalar_lea.hbm %s795_s11, 256  ;;  %s594_s25 = scalar_lea.hbm %s846_s5, 512 }
 0x257   : > { %p591_p8 = scmp.ne.s32.totalorder %s795_s11, %s590_s16  ;;  %p595_p1 = scmp.lt.u32.totalorder %s795_s11, %s846_s5 }
 0x258   : > { %p596_p0 = scmp.lt.u32.totalorder %s594_s25, %s590_s16  ;;  %p598_p6 = scmp.lt.u32.totalorder %s590_s16, %s795_s11 }
 0x259   : > { %p592_p11 = pnand %p591_p8, %p857_p9 }
 0x25a   : > { %p597_p5 = por %p596_p0, %p595_p1 }
 0x25b   : > { %p593_p13 = pneg %p592_p11 }
 0x25c   : > { %p599_p10 = por %p598_p6, %p597_p5 }
 0x25e   : > { %p600_p12 = pnand %p599_p10, %p593_p13 }
 0x260   : > { %603 = shalt.err (!%p600_p12)
}
 0x261   : > { %s650_s8 = smov 128   ;;  %s651_s9 = smov 8  }
 0x262   : > { %489 = dma.vmem_to_hbm [thread:$0]  (%p857_p9), %s797_s30, 256, %s795_s11, %s800_s12, %s650_s8, %s650_s8, %s651_s9  }
 0x263 PF: > { %p501_p2 = scmp.ge.s32.totalorder %s642_s21, 2  ;;  %s390_s7 = sand.u32 1, %s630_s18  }
 0x264   : > { %p858_p3 = scmp.ne.s32.totalorder %s851_s29, 0  ;;  %s391_s10 = scalar_lea.sflag [#allocation4], %s390_s7 }
 0x266   : > { %p496_p4 = pnand %p501_p2, %p858_p3 }
 0x268   : > { %625 = dma.done.wait (!%p496_p4), %s391_s10, 256  }
 0x269   : > { %627 = vsyncadd (!%p496_p4), %s391_s10, 4294967040  ;;  %p16_p7 = scmp.ge.s32.totalorder %s707_s24, 4   ;;  %s859_s18 = smov %s634_s19 }
 0x26a   : > { %s860_s19 = smov %s638_s20  ;;  %s861_s20 = smov %s718_s27 }
 0x26b   : > { %s862_s21 = smov %s707_s24  ;;  %18 = sbr.rel (!%p16_p7) target bundleno = 4 (0x4), region = 80 }
 0x272   :  { %396 = vsyncpa [#allocation3], 1 }
 0x273   :  { %398 = vsyncpa [#allocation3 + $0x1], 1 }
 0x274   :  { %399 = vsyncpa [#allocation4], 1 }
 0x275   :  { %401 = vsyncpa [#allocation4 + $0x1], 1 }

</bundles_post_ra>
